<compile_context>
chip_gen: v7x
topology: tpu7x:2x2x1
jax: 0.10.0
libtpu: 0.0.40
codegen_flags: <defaults>
</compile_context>

<pallas_src>
import jax
import jax.numpy as jnp
from jax.experimental import pallas as pl
from jax.experimental.pallas import tpu as pltpu


def mlp_kernel(xt_ref, w1_ref, b1_ref, w2_ref, b2_ref, w3_ref, b3_ref, ot_ref):
    # xt: [in, B] f32 -> pack to bf16 in-kernel (MXU operand); accumulate f32.
    xt = xt_ref[...].astype(jnp.bfloat16)
    # fc1 + ReLU : [hid, in] @ [in, B] -> [hid, B]
    h1 = jnp.dot(w1_ref[...], xt, preferred_element_type=jnp.float32)
    h1 = jnp.maximum(h1 + b1_ref[...], 0.0)          # bias is [hid, 1] -> lane splat
    # fc2 + ReLU : [hid, hid] @ [hid, B] -> [hid, B]
    h2 = jnp.dot(w2_ref[...], h1.astype(jnp.bfloat16),
                 preferred_element_type=jnp.float32)
    h2 = jnp.maximum(h2 + b2_ref[...], 0.0)
    # fc3 (no activation) : [out, hid] @ [hid, B] -> [out, B]
    out = jnp.dot(w3_ref[...], h2.astype(jnp.bfloat16),
                  preferred_element_type=jnp.float32)
    ot_ref[...] = (out + b3_ref[...]).astype(ot_ref.dtype)


@jax.jit
def net_forward(x, w1_bf16, b1, w2_bf16, b2, w3_bf16, b3):
    """x: [B, in] f32. w*: PyTorch-native [out, in], already bf16. b*: [out, 1] f32."""
    B, in_dim = x.shape
    hid = w1_bf16.shape[0]
    out_dim = w3_bf16.shape[0]

    xt = x.T  # [in, B] -- tiny layout plumbing in XLA, keeps kernel lane-dense

    flops = 2 * B * (in_dim * hid + hid * hid + hid * out_dim)
    bytes_accessed = (
        4 * x.size                                              # f32 x
        + 2 * (w1_bf16.size + w2_bf16.size + w3_bf16.size)      # bf16 weights
        + 4 * (b1.size + b2.size + b3.size)                     # f32 biases
        + 4 * B * out_dim                                       # f32 output
    )

    vmem_spec = pl.BlockSpec(memory_space=pltpu.MemorySpace.VMEM)
    out_t = pl.pallas_call(
        mlp_kernel,
        out_shape=jax.ShapeDtypeStruct((out_dim, B), jnp.float32),
        in_specs=[vmem_spec] * 7,
        out_specs=vmem_spec,
        cost_estimate=pl.CostEstimate(
            flops=flops, transcendentals=0, bytes_accessed=bytes_accessed),
    )(xt, w1_bf16, b1, w2_bf16, b2, w3_bf16, b3)

    return out_t.T  # [B, out_dim], standard nn.Linear output layout


def init_linear(key, fan_in, fan_out):
    """Mimic PyTorch nn.Linear default init: U(-1/sqrt(fan_in), 1/sqrt(fan_in)).

    Returns PyTorch-native layouts: W [out, in], b [out, 1].
    """
    kw, kb = jax.random.split(key)
    bound = 1.0 / jnp.sqrt(fan_in)
    w = jax.random.uniform(kw, (fan_out, fan_in), jnp.float32, -bound, bound)
    b = jax.random.uniform(kb, (fan_out, 1), jnp.float32, -bound, bound)
    return w, b


if __name__ == "__main__":
    # Small shapes consistent with the MLP: batch=128, input=16, hidden=32, output=8
    input_size, hidden_size, output_size = 16, 32, 8
    batch = 128

    key = jax.random.PRNGKey(0)
    kx, k1, k2, k3 = jax.random.split(key, 4)

    x = jax.random.normal(kx, (batch, input_size), jnp.float32)
    w1, b1 = init_linear(k1, input_size, hidden_size)
    w2, b2 = init_linear(k2, hidden_size, hidden_size)
    w3, b3 = init_linear(k3, hidden_size, output_size)

    # Weights stored as bf16 ONCE here (outside jit) -> no per-call casts.
    w1_b = w1.astype(jnp.bfloat16)
    w2_b = w2.astype(jnp.bfloat16)
    w3_b = w3.astype(jnp.bfloat16)

    out = net_forward(x, w1_b, b1, w2_b, b2, w3_b, b3)
    out = jax.block_until_ready(out)
    assert out.shape == (batch, output_size)

    # Reference with the same bf16-operand / f32-accumulate precision.
    def ref_bf16(x, w1b, b1, w2b, b2, w3b, b3):
        h = jnp.maximum(
            jnp.dot(x.astype(jnp.bfloat16), w1b.T,
                    preferred_element_type=jnp.float32) + b1.T, 0.0)
        h = jnp.maximum(
            jnp.dot(h.astype(jnp.bfloat16), w2b.T,
                    preferred_element_type=jnp.float32) + b2.T, 0.0)
        return jnp.dot(h.astype(jnp.bfloat16), w3b.T,
                       preferred_element_type=jnp.float32) + b3.T

    assert jnp.allclose(out, ref_bf16(x, w1_b, b1, w2_b, b2, w3_b, b3),
                        atol=1e-4, rtol=1e-4)

    # Full-f32 module semantics check (loose tolerance due to bf16 MXU operands).
    h = jnp.maximum(x @ w1.T + b1.T, 0.0)
    h = jnp.maximum(h @ w2.T + b2.T, 0.0)
    ref_f32 = h @ w3.T + b3.T
    assert jnp.allclose(out, ref_f32, atol=1e-1, rtol=1e-1)

    print("KERNEL_OK")
</pallas_src>

<mosaic_0001>
module attributes {stable_mosaic.version = 11 : i64} {
  func.func @mlp_kernel(%arg0: memref<16x128xf32, #tpu.memory_space<vmem>>, %arg1: memref<32x16xbf16, #tpu.memory_space<vmem>>, %arg2: memref<32x1xf32, #tpu.memory_space<vmem>>, %arg3: memref<32x32xbf16, #tpu.memory_space<vmem>>, %arg4: memref<32x1xf32, #tpu.memory_space<vmem>>, %arg5: memref<8x32xbf16, #tpu.memory_space<vmem>>, %arg6: memref<8x1xf32, #tpu.memory_space<vmem>>, %arg7: memref<8x128xf32, #tpu.memory_space<vmem>>) attributes {dimension_semantics = [], scalar_prefetch = 0 : i64, scratch_operands = 0 : i64, tpu.core_type = #tpu.core_type<tc>} {
    %c0 = arith.constant 0 : index
    %c0_0 = arith.constant 0 : index
    %0 = vector.load %arg0[%c0, %c0_0] : memref<16x128xf32, #tpu.memory_space<vmem>>, vector<16x128xf32>
    %1 = arith.truncf %0 : vector<16x128xf32> to vector<16x128xbf16>
    %c0_1 = arith.constant 0 : index
    %c0_2 = arith.constant 0 : index
    %2 = vector.load %arg1[%c0_1, %c0_2] : memref<32x16xbf16, #tpu.memory_space<vmem>>, vector<32x16xbf16>
    %cst = arith.constant dense<0.000000e+00> : vector<32x128xf32>
    %3 = tpu.matmul %2, %1, %cst {dimension_numbers = #tpu.dot_dimension_numbers<[1], [0], [0], [1], [0, 0, 1, 1], [], []>} : vector<32x16xbf16>, vector<16x128xbf16>, vector<32x128xf32> -> vector<32x128xf32>
    %c0_3 = arith.constant 0 : index
    %c0_4 = arith.constant 0 : index
    %4 = vector.load %arg2[%c0_3, %c0_4] : memref<32x1xf32, #tpu.memory_space<vmem>>, vector<32x1xf32>
    %5 = vector.broadcast %4 : vector<32x1xf32> to vector<32x128xf32>
    %6 = arith.addf %3, %5 : vector<32x128xf32>
    %cst_5 = arith.constant 0.000000e+00 : f32
    %7 = vector.broadcast %cst_5 : f32 to vector<32x128xf32>
    %8 = arith.maximumf %6, %7 : vector<32x128xf32>
    %c0_6 = arith.constant 0 : index
    %c0_7 = arith.constant 0 : index
    %9 = vector.load %arg3[%c0_6, %c0_7] : memref<32x32xbf16, #tpu.memory_space<vmem>>, vector<32x32xbf16>
    %10 = arith.truncf %8 : vector<32x128xf32> to vector<32x128xbf16>
    %cst_8 = arith.constant dense<0.000000e+00> : vector<32x128xf32>
    %11 = tpu.matmul %9, %10, %cst_8 {dimension_numbers = #tpu.dot_dimension_numbers<[1], [0], [0], [1], [0, 0, 1, 1], [], []>} : vector<32x32xbf16>, vector<32x128xbf16>, vector<32x128xf32> -> vector<32x128xf32>
    %c0_9 = arith.constant 0 : index
    %c0_10 = arith.constant 0 : index
    %12 = vector.load %arg4[%c0_9, %c0_10] : memref<32x1xf32, #tpu.memory_space<vmem>>, vector<32x1xf32>
    %13 = vector.broadcast %12 : vector<32x1xf32> to vector<32x128xf32>
    %14 = arith.addf %11, %13 : vector<32x128xf32>
    %cst_11 = arith.constant 0.000000e+00 : f32
    %15 = vector.broadcast %cst_11 : f32 to vector<32x128xf32>
    %16 = arith.maximumf %14, %15 : vector<32x128xf32>
    %c0_12 = arith.constant 0 : index
    %c0_13 = arith.constant 0 : index
    %17 = vector.load %arg5[%c0_12, %c0_13] : memref<8x32xbf16, #tpu.memory_space<vmem>>, vector<8x32xbf16>
    %18 = arith.truncf %16 : vector<32x128xf32> to vector<32x128xbf16>
    %cst_14 = arith.constant dense<0.000000e+00> : vector<8x128xf32>
    %19 = tpu.matmul %17, %18, %cst_14 {dimension_numbers = #tpu.dot_dimension_numbers<[1], [0], [0], [1], [0, 0, 1, 1], [], []>} : vector<8x32xbf16>, vector<32x128xbf16>, vector<8x128xf32> -> vector<8x128xf32>
    %c0_15 = arith.constant 0 : index
    %c0_16 = arith.constant 0 : index
    %20 = vector.load %arg6[%c0_15, %c0_16] : memref<8x1xf32, #tpu.memory_space<vmem>>, vector<8x1xf32>
    %21 = vector.broadcast %20 : vector<8x1xf32> to vector<8x128xf32>
    %22 = arith.addf %19, %21 : vector<8x128xf32>
    %c0_17 = arith.constant 0 : index
    %c0_18 = arith.constant 0 : index
    %23 = vector.load %arg7[%c0_17, %c0_18] : memref<8x128xf32, #tpu.memory_space<vmem>>, vector<8x128xf32>
    tpu.vector_store %arg7[%c0_17, %c0_18], %22 {strides = array<i32>} : memref<8x128xf32, #tpu.memory_space<vmem>>, vector<8x128xf32>,
    return
  }
}

</mosaic_0001>

<bundles_post_ra>
// kernel: net_forward.1
= control target key start
LH: loop header
LB: loop body
LE: loop exit
PB: predicated region body
PF: predicated region fallthrough
CT: control target
= control target key end

     0   :  { %vm69_vm0 = vcmask 130048   ;;  %v371_v4 = vmov 0   ;;  %s480_s0 = inlined_call_operand.vmem [shape: f32[16,128], index: 0, kind: input, shape index: {}]   ;;  %s481_s1 = inlined_call_operand.vmem [shape: bf16[32,16], index: 1, kind: input, shape index: {}]   ;;  %s482_s2 = inlined_call_operand.vmem [shape: f32[32,1], index: 2, kind: input, shape index: {}]   ;;  %s483_s3 = inlined_call_operand.vmem [shape: bf16[32,32], index: 3, kind: input, shape index: {}]   ;;  %s484_s4 = inlined_call_operand.vmem [shape: f32[32,1], index: 4, kind: input, shape index: {}]   ;;  %s485_s5 = inlined_call_operand.vmem [shape: bf16[8,32], index: 5, kind: input, shape index: {}]   ;;  %s486_s6 = inlined_call_operand.vmem [shape: f32[8,1], index: 6, kind: input, shape index: {}]   ;;  %s487_s7 = inlined_call_operand.hbm [shape: f32[8,128], index: 7, kind: output, shape index: {}]  }
   0x1   :  { %v28_v0 = vld [vmem:[%s480_s0] sm:$0xff]  ;;  %v29_v1 = vld [vmem:[%s480_s0 + $0x8] sm:$0xff]  ;;  %341 = vset.pattern.permute.xlu0 %v371_v4  ;;  %342 = vset.pattern.permute.xlu1 %v371_v4  ;;  %v37_v7 = vld [vmem:[%s482_s2 + $0x10] sm:$0xff] }
   0x2   :  { %v30_v2 = vpack.c.bf16 %v29_v1, %v28_v0  ;;  %v343_v3 = vld [vmem:[%s481_s1] sm:$0xff]   ;;  %v344_v6 = vld [vmem:[%s481_s1 + $0x8] sm:$0xff]   ;;  %51 = vperm.xlu1 %342, %v37_v7   ;;  %v38_v9 = vld [vmem:[%s482_s2 + $0x18] sm:$0xff] }
   0x3   :  { %v35_v5 = vld [vmem:[%s482_s2] sm:$0xff]  ;;  %317 = vmatprep.mubr.msk.bf16.mxu0 %vm69_vm0, %v343_v3  ;;  %v36_v8 = vld [vmem:[%s482_s2 + $0x8] sm:$0xff] }
   0x4   :  { %315 = vmatprep.subr.bf16.mxu0 %v30_v2  ;;  %41 = vperm.xlu0 %341, %v35_v5  }
   0x5   :  { %316 = vmatpush3.bf16.msra.mxu0 %v30_v2 }
   0x8   :  { %318 = vmatmul.mubr.msk.bf16.vlgmr.msra.gmra.mrb[0].mxu0 %vm69_vm0, %v344_v6 }
   0x9   :  { %12 = vsyncpa [#allocation3], 0  ;;  %46 = vperm.xlu0 %341, %v36_v8   ;;  %v135_v10 = vld [vmem:[%s484_s4] sm:$0xff]  ;;  %56 = vperm.xlu1 %342, %v38_v9   ;;  %v136_v11 = vld [vmem:[%s484_s4 + $0x8] sm:$0xff]  ;;  %vm169_vm1 = vcmask 261120   ;;  %v372_v35 = vmov 0.0  }
   0xa   :  { %v137_v12 = vld [vmem:[%s484_s4 + $0x10] sm:$0xff]  ;;  %v138_v13 = vld [vmem:[%s484_s4 + $0x18] sm:$0xff]  ;;  %v232_v14 = vld [vmem:[%s486_s6] sm:$0xff]  ;;  %329 = vmatprep.subr.bf16.mxu0 %v372_v35  ;;  %vm373_vm2 = vmmov 0   ;;  %s374_s27 = smov [#allocation2]  }
   0xb   :  { %v345_v15 = vld [vmem:[%s483_s3] sm:$0xff]   ;;  %v346_v34 = vld [vmem:[%s483_s3 + $0x8] sm:$0xff]   ;;  %333 = vmatprep.mubr.msk.bf16.mxu0 %vm373_vm2, %v372_v35  ;;  %s288_s28 = sshll.u32 %s374_s27, 4  ;;  %s289_s28 = int_to_ptr.vmem [resolvable:$true] %s288_s28 }
   0xc   :  { %325 = vmatprep.mubr.msk.bf16.mxu1 %vm169_vm1, %v345_v15  ;;  %v229_v54 = vld [vmem:[%s485_s5] sm:$0xf]  ;;  %s347_s29 = scalar_lea.vmem %s289_s28, 128  ;;  %p352_p1 = scmp.lt.s32.totalorder %s289_s28, %s289_s28 }
   0xd   :  { %141 = vperm.xlu0 %341, %v135_v10   ;;  %146 = vperm.xlu1 %342, %v136_v11   ;;  %p348_p0 = scmp.ne.s32.totalorder %s289_s28, %s347_s29  ;;  %p353_p2 = scmp.lt.s32.totalorder %s347_s29, %s347_s29 }
   0xf   :  { %p354_p3 = por %p353_p2, %p352_p1 }
  0x11   :  { %151 = vperm.xlu0 %341, %v137_v12   ;;  %156 = vperm.xlu1 %342, %v138_v13   ;;  %p355_p4 = pnand %p354_p3, %p348_p0 }
  0x15   :  { %235 = vperm.xlu0 %341, %v232_v14  }
  0x81   :  { %v52_v16 = vpop.permute.xlu1 %51 }
  0x83   :  { %v42_v17 = vpop.permute.xlu0 %41 }
  0x88   :  { %v57_v21 = vpop.permute.xlu1 %56  ;;  %v47_v24 = vpop.permute.xlu0 %46 }
  0x8c   :  { %v142_v36 = vpop.permute.xlu0 %141  ;;  %v147_v37 = vpop.permute.xlu1 %146 }
  0x90   :  { %v152_v38 = vpop.permute.xlu0 %151  ;;  %v157_v42 = vpop.permute.xlu1 %156 }
  0x94   :  { %v236_v55 = vpop.permute.xlu0 %235 }
  0xdb   :  { %v319_v18 = vpop.f32.mrb[0].mxu0 }
  0xdc   :  { %v119_v19 = vadd.f32 %v319_v18, %v52_v16  ;;  %v110_v20 = vpop.f32.mrb[1].mxu0 }
  0xdd   :  { %v111_v22 = vadd.f32 %v110_v20, %v42_v17  ;;  %v320_v23 = vpop.f32.mrb[2].mxu0 }
  0xde   :  { %v122_v25 = vadd.f32 %v320_v23, %v57_v21  ;;  %v113_v26 = vpop.f32.mrb[3].mxu0  ;;  %v127_v28 = vmax.f32 %v119_v19, 0.0 }
  0xdf   :  { %v114_v27 = vadd.f32 %v113_v26, %v47_v24  ;;  %v125_v30 = vmax.f32 %v111_v22, 0.0 }
  0xe0   :  { %v128_v29 = vmax.f32 %v122_v25, 0.0 }
  0xe1   :  { %v126_v31 = vmax.f32 %v114_v27, 0.0 }
  0xe2   :  { %v134_v32 = vpack.c.bf16 %v128_v29, %v127_v28 }
  0xe3   :  { %v133_v33 = vpack.c.bf16 %v126_v31, %v125_v30 }
  0xe5   :  { %321 = vmatprep.subr.bf16.mxu1 %v133_v33 }
  0xe6   :  { %322 = vmatpush3.bf16.msra.mxu1 %v133_v33 }
  0xe7   :  { %323 = vmatprep.subr.bf16.mxu1 %v134_v32 }
  0xea   :  { %324 = vmatpush3.bf16.msra.mxu1 %v134_v32 }
  0xed   :  { %326 = vmatmul.mubr.msk.bf16.vlgmr.msra.gmra.mrb[0].mxu1 %vm169_vm1, %v346_v34 }
 0x1c0   :  { %v327_v39 = vpop.f32.mrb[0].mxu1 }
 0x1c1   :  { %v219_v40 = vadd.f32 %v327_v39, %v152_v38  ;;  %v210_v41 = vpop.f32.mrb[1].mxu1 }
 0x1c2   :  { %v211_v43 = vadd.f32 %v210_v41, %v142_v36  ;;  %v328_v44 = vpop.f32.mrb[2].mxu1 }
 0x1c3   :  { %v222_v45 = vadd.f32 %v328_v44, %v157_v42  ;;  %v213_v46 = vpop.f32.mrb[3].mxu1  ;;  %v227_v48 = vmax.f32 %v219_v40, 0.0 }
 0x1c4   :  { %v214_v47 = vadd.f32 %v213_v46, %v147_v37  ;;  %v225_v50 = vmax.f32 %v211_v43, 0.0 }
 0x1c5   :  { %v228_v49 = vmax.f32 %v222_v45, 0.0 }
 0x1c6   :  { %v226_v51 = vmax.f32 %v214_v47, 0.0 }
 0x1c7   :  { %v231_v52 = vpack.c.bf16 %v228_v49, %v227_v48 }
 0x1c8   :  { %v230_v53 = vpack.c.bf16 %v226_v51, %v225_v50 }
 0x1ca   :  { %330 = vmatpush3.bf16.msra.mxu0 %v230_v53 }
 0x1cb   :  { %331 = vmatprep.subr.bf16.mxu0 %v372_v35 }
 0x1ce   :  { %332 = vmatpush3.bf16.msra.mxu0 %v231_v52 }
 0x1d1   :  { %334 = vmatmul.mubr.msk.bf16.vlgmr.msra.gmra.mrb[4].mxu0 %vm169_vm1, %v229_v54 }
 0x2a4   :  { %v275_v56 = vpop.f32.mrb[4].mxu0 }
 0x2a5   :  { %v276_v57 = vadd.f32 %v275_v56, %v236_v55  ;;  %v335_v58 = vpop.f32.mrb[5].mxu0 }
 0x2a6   :  { %v278_v59 = vpop.f32.mrb[6].mxu0 }
 0x2a7   :  { %281 = vst [vmem:[#allocation2] sm:$0xff] %v276_v57  ;;  %v336_v60 = vpop.f32.mrb[7].mxu0 }
 0x2a8   :  { %358 = shalt.err (!%p355_p4)
}
 0x2a9   :  { %s359_s8 = scalar_lea.hbm %s487_s7, 128 }
 0x2aa   :  { %p360_p5 = scmp.ne.s32.totalorder %s487_s7, %s359_s8  ;;  %p363_p6 = scmp.lt.u32.totalorder %s359_s8, %s487_s7 }
 0x2ac   :  { %p365_p7 = pnand %p363_p6, %p360_p5 }
 0x2ae   :  { %368 = shalt.err (!%p365_p7)
}
 0x2af   :  { %291 = dma.vmem_to_hbm [thread:$0]  %s289_s28, 128, %s487_s7, [#allocation3]  }
 0x2b0   :  { %369 = dma.done.wait [#allocation3], 128  }
 0x2b1   :  { %370 = vsyncadd [#allocation3], 4294967168 }
 0x2b2   :  { %295 = vsyncpa [#allocation3], 1 }

</bundles_post_ra>
